<compile_context>
chip_gen: v7x
topology: tpu7x:2x2x1
jax: 0.10.0
libtpu: 0.0.40
codegen_flags: <defaults>
</compile_context>

<pallas_src>
import jax
import jax.numpy as jnp
from jax import lax
from jax.experimental import pallas as pl
from jax.experimental.pallas import tpu as pltpu

LN_EPS = 1e-5  # PyTorch nn.LayerNorm default


def sgu_kernel(res_ref, gate_ref, w_ref, bias_ref, gamma_ref, beta_ref,
               o_ref, gln_ref):
    """One grid step processes `block_b` batch rows.

    res_ref / gate_ref / o_ref : (block_b, n, d_out)
    w_ref    : (h, n, n)   in matmul dtype (cast in the wrapper)
    bias_ref : (1, n, d_out) f32, pre-broadcast full-width bias slab
    gamma_ref / beta_ref : (1, 1, d_out) f32
    gln_ref  : (block_b, n, d_out) VMEM scratch in matmul dtype
    """
    block_b, n, d_out = gate_ref.shape
    h = w_ref.shape[0]
    d_head = d_out // h

    # Tiny (1, d_out) values: safe to keep resident across the batch loop.
    gamma = gamma_ref[0]
    beta = beta_ref[0]

    def row_body(b, carry):
        # --- LayerNorm (one pass, f32) over the feature/lane axis -----------
        g = gate_ref[b].astype(jnp.float32)                       # (n, d_out)
        mean = jnp.mean(g, axis=-1, keepdims=True)
        msq = jnp.mean(g * g, axis=-1, keepdims=True)
        var = jnp.maximum(msq - mean * mean, 0.0)
        g_ln = (g - mean) * lax.rsqrt(var + LN_EPS) * gamma + beta
        # Stage into VMEM scratch: bounds vreg live ranges and gives the
        # per-head matmuls a ref they can lane-slice with pl.ds.
        gln_ref[b] = g_ln.astype(gln_ref.dtype)

        # --- Per-head spatial mixing on the MXU ------------------------------
        # out[m, h*d_head + d] = sum_n W[h, m, n] * gate_ln[n, h*d_head + d]
        # Head offsets are compile-time constants (static Python loop), so the
        # slices are already aligned; pl.multiple_of is not needed.
        outs = []
        for head in range(h):
            lo = head * d_head
            g_h = gln_ref[b, :, pl.ds(lo, d_head)]                # (n, d_head)
            w_h = w_ref[head]                                     # (n, n)
            outs.append(jnp.dot(w_h, g_h, preferred_element_type=jnp.float32))
        row = outs[0] if h == 1 else jnp.concatenate(outs, axis=-1)  # (n, d_out)

        # Bias was pre-broadcast in the wrapper: a single lane-dense VPU add,
        # no per-iteration broadcast_in_dim.
        row = row + bias_ref[0]

        # Gate * residual, one full-width lane-dense store per batch row.
        res_row = res_ref[b].astype(jnp.float32)
        o_ref[b] = (row * res_row).astype(o_ref.dtype)
        return carry

    lax.fori_loop(0, block_b, row_body, 0, unroll=block_b <= 8)


def _pick_block_b(B, per_row_bytes, const_bytes, vmem_cap):
    """Largest batch tile whose pipeline footprint fits a generation-aware VMEM
    budget, preferring an even number of grid steps (v7x has 2 TensorCores)."""
    budget = min(max(vmem_cap // 3, 16 << 20), 24 << 20)
    avail = max(budget - const_bytes, per_row_bytes)
    cap = max(1, avail // per_row_bytes)
    divisors = [d for d in range(1, B + 1) if B % d == 0]

    def best(pred):
        cands = [d for d in divisors if d <= cap and pred(B // d)]
        return max(cands) if cands else None

    return (best(lambda g: g >= 2 and g % 2 == 0)   # even split across 2 TCs
            or best(lambda g: g >= 2)               # keep the pipeline busy
            or best(lambda g: True)
            or 1)


def spatial_gating_unit(x, weight, bias, ln_gamma, ln_beta, *,
                        block_b=None, matmul_dtype=jnp.bfloat16):
    """x: (B, n, dim); weight: (h, n, n); bias: (h, n); ln_*: (dim//2,)."""
    B, n, dim = x.shape
    assert dim % 2 == 0, "dim must be even (chunk into res/gate halves)"
    d_out = dim // 2
    h = weight.shape[0]
    assert d_out % h == 0, "dim // 2 must be divisible by heads"
    assert weight.shape == (h, n, n)
    assert bias.shape == (h, n)
    assert ln_gamma.shape == (d_out,) and ln_beta.shape == (d_out,)
    d_head = d_out // h

    if matmul_dtype is None:
        matmul_dtype = jnp.float32
    matmul_dtype = jnp.dtype(matmul_dtype)

    # MXU operands: cast the weight once in the wrapper (also halves its DMA
    # footprint when bf16). Accumulation stays f32 inside the kernel.
    weight_mm = weight.astype(matmul_dtype)
    # Pre-broadcast bias to a full-width (n, d_out) slab:
    # bias_full[m, h*d_head + d] = bias[h, m]  (hoists the broadcast entirely
    # out of the kernel's batch loop).
    bias_full = jnp.repeat(bias.T.astype(jnp.float32), d_head, axis=-1)
    bias_full = bias_full.reshape(1, n, d_out)
    gamma3 = ln_gamma.reshape(1, 1, d_out).astype(jnp.float32)
    beta3 = ln_beta.reshape(1, 1, d_out).astype(jnp.float32)

    # --- VMEM budgeting / batch tile -----------------------------------------
    act_item = jnp.dtype(x.dtype).itemsize
    mm_item = matmul_dtype.itemsize
    row_tile = n * d_out
    per_row_bytes = (4 * row_tile * act_item      # gate + res inputs, 2x buffered
                     + 2 * row_tile * act_item    # output, 2x buffered
                     + row_tile * mm_item)        # LN scratch (single copy)
    const_bufs = 1 if hasattr(pl, "Buffered") else 2
    const_bytes = const_bufs * (h * n * n * mm_item            # weight
                                + (n * d_out + 2 * d_out) * 4)  # bias/gamma/beta

    try:
        vmem_cap = int(pltpu.get_tpu_info().vmem_capacity_bytes)
    except Exception:
        vmem_cap = 64 << 20  # v7x per-core floor

    if block_b is None:
        block_b = _pick_block_b(B, per_row_bytes, const_bytes, vmem_cap)
    assert B % block_b == 0, "block_b must divide the batch size"
    grid_b = B // block_b

    needed = block_b * per_row_bytes + const_bytes + (1 << 20)
    vmem_limit = int(min(max(2 * needed, 32 << 20),
                         max(vmem_cap - (4 << 20), needed)))

    # --- res/gate split -------------------------------------------------------
    if d_out % 128 == 0:
        # Lane-aligned halves: split with BlockSpec index_maps (x passed twice,
        # no wrapper-side half copies are materialized in HBM).
        res_arg, gate_arg = x, x
        res_spec = pl.BlockSpec((block_b, n, d_out), lambda i: (i, 0, 0))
        gate_spec = pl.BlockSpec((block_b, n, d_out), lambda i: (i, 0, 1))
    else:
        # Toy widths: a last-axis block narrower than 128 lanes cannot tile the
        # wider array, so fall back to wrapper-side slices.
        res_arg = x[..., :d_out]
        gate_arg = x[..., d_out:]
        res_spec = pl.BlockSpec((block_b, n, d_out), lambda i: (i, 0, 0))
        gate_spec = pl.BlockSpec((block_b, n, d_out), lambda i: (i, 0, 0))

    compiler_params = pltpu.CompilerParams(
        dimension_semantics=("parallel",),
        vmem_limit_bytes=vmem_limit)

    def build(single_buffer_consts):
        def const_spec(shape):
            if single_buffer_consts:
                return pl.BlockSpec(shape, lambda i: (0,) * len(shape),
                                    pipeline_mode=pl.Buffered(1))
            return pl.BlockSpec(shape, lambda i: (0,) * len(shape))

        return pl.pallas_call(
            sgu_kernel,
            out_shape=jax.ShapeDtypeStruct((B, n, d_out), x.dtype),
            grid=(grid_b,),
            in_specs=[
                res_spec,
                gate_spec,
                const_spec((h, n, n)),        # weight (matmul dtype)
                const_spec((1, n, d_out)),    # pre-broadcast bias slab (f32)
                const_spec((1, 1, d_out)),    # LayerNorm gamma
                const_spec((1, 1, d_out)),    # LayerNorm beta
            ],
            out_specs=pl.BlockSpec((block_b, n, d_out), lambda i: (i, 0, 0)),
            scratch_shapes=[pltpu.VMEM((block_b, n, d_out), matmul_dtype)],
            compiler_params=compiler_params,
        )

    args = (res_arg, gate_arg, weight_mm, bias_full, gamma3, beta3)
    if hasattr(pl, "Buffered"):
        try:
            return build(True)(*args)
        except Exception:
            pass  # lowering without single-buffer support: use default buffering
    return build(False)(*args)


def reference_sgu(x, weight, bias, ln_gamma, ln_beta):
    """Pure-JAX reference mirroring the PyTorch forward (two-pass LayerNorm)."""
    B, n, dim = x.shape
    d_out = dim // 2
    h = weight.shape[0]
    res, gate = x[..., :d_out], x[..., d_out:]
    mean = jnp.mean(gate, axis=-1, keepdims=True)
    var = jnp.mean(jnp.square(gate - mean), axis=-1, keepdims=True)
    gate = (gate - mean) / jnp.sqrt(var + LN_EPS) * ln_gamma + ln_beta
    gate = gate.reshape(B, n, h, d_out // h).transpose(0, 2, 1, 3)  # b h n d
    gate = jnp.einsum('bhnd,hmn->bhmd', gate, weight)
    gate = gate + bias[None, :, :, None]
    gate = gate.transpose(0, 2, 1, 3).reshape(B, n, d_out)
    return gate * res


if __name__ == "__main__":
    # Module hyperparams: dim=256, dim_seq=16, heads=2, causal=False,
    # circulant_matrix=False, act=Identity, init_eps=0.001; batch=2.
    # d_out = 128 keeps the halves lane-aligned (BlockSpec-split fast path).
    dim, dim_seq, heads, batch = 256, 16, 2, 2
    d_out = dim // 2
    init_eps = 0.001 / dim_seq

    key = jax.random.PRNGKey(0)
    k_x, k_w, k_g, k_b = jax.random.split(key, 4)

    x = jax.random.normal(k_x, (batch, dim_seq, dim), dtype=jnp.float32)
    # nn.init.uniform_(weight, -init_eps, init_eps)
    weight = jax.random.uniform(k_w, (heads, dim_seq, dim_seq),
                                dtype=jnp.float32,
                                minval=-init_eps, maxval=init_eps)
    bias = jnp.ones((heads, dim_seq), dtype=jnp.float32)
    # LayerNorm affine params (init is ones/zeros; perturb to exercise the path).
    ln_gamma = 1.0 + 0.1 * jax.random.normal(k_g, (d_out,), dtype=jnp.float32)
    ln_beta = 0.05 * jax.random.normal(k_b, (d_out,), dtype=jnp.float32)

    ref = reference_sgu(x, weight, bias, ln_gamma, ln_beta)

    # Strict-tolerance path: f32 MXU operands.
    out_f32 = spatial_gating_unit(x, weight, bias, ln_gamma, ln_beta,
                                  matmul_dtype=jnp.float32)
    out_f32 = jax.block_until_ready(out_f32)
    assert out_f32.shape == (batch, dim_seq, d_out)
    assert jnp.allclose(out_f32, ref, atol=1e-5, rtol=1e-5), "f32 mismatch"

    # Default fast path: bf16 MXU operands, f32 accumulation.
    out_bf16 = spatial_gating_unit(x, weight, bias, ln_gamma, ln_beta)
    out_bf16 = jax.block_until_ready(out_bf16)
    assert jnp.allclose(out_bf16, ref, atol=1e-4, rtol=1e-4), "bf16 mismatch"

    print("KERNEL_OK")
</pallas_src>

<mosaic_0001>
module attributes {stable_mosaic.version = 11 : i64} {
  func.func @sgu_kernel(%arg0: i32, %arg1: memref<1x16x128xf32, #tpu.memory_space<vmem>>, %arg2: memref<1x16x128xf32, #tpu.memory_space<vmem>>, %arg3: memref<2x16x16xf32, #tpu.memory_space<vmem>>, %arg4: memref<1x16x128xf32, #tpu.memory_space<vmem>>, %arg5: memref<1x1x128xf32, #tpu.memory_space<vmem>>, %arg6: memref<1x1x128xf32, #tpu.memory_space<vmem>>, %arg7: memref<1x16x128xf32, #tpu.memory_space<vmem>>, %arg8: memref<1x16x128xf32, #tpu.memory_space<vmem>>) attributes {dimension_semantics = [#tpu.dimension_semantics<parallel>], iteration_bounds = array<i64: 2>, scalar_prefetch = 0 : i64, scratch_operands = 1 : i64, tpu.core_type = #tpu.core_type<tc>, window_params = [{transform_indices = @transform_0, window_bounds = array<i64: 1, 16, 128>}, {transform_indices = @transform_1, window_bounds = array<i64: 1, 16, 128>}, {pipeline_mode = #tpu.pipeline_mode<synchronous>, transform_indices = @transform_2, window_bounds = array<i64: 2, 16, 16>}, {pipeline_mode = #tpu.pipeline_mode<synchronous>, transform_indices = @transform_3, window_bounds = array<i64: 1, 16, 128>}, {pipeline_mode = #tpu.pipeline_mode<synchronous>, transform_indices = @transform_4, window_bounds = array<i64: 1, 1, 128>}, {pipeline_mode = #tpu.pipeline_mode<synchronous>, transform_indices = @transform_5, window_bounds = array<i64: 1, 1, 128>}, {transform_indices = @transform_6, window_bounds = array<i64: 1, 16, 128>}]} {
    %c0 = arith.constant 0 : index
    %c0_0 = arith.constant 0 : index
    %c0_1 = arith.constant 0 : index
    %0 = vector.load %arg5[%c0, %c0_0, %c0_1] : memref<1x1x128xf32, #tpu.memory_space<vmem>>, vector<1x1x128xf32>
    %1 = vector.shape_cast %0 : vector<1x1x128xf32> to vector<1x128xf32>
    %c0_2 = arith.constant 0 : index
    %c0_3 = arith.constant 0 : index
    %c0_4 = arith.constant 0 : index
    %2 = vector.load %arg6[%c0_2, %c0_3, %c0_4] : memref<1x1x128xf32, #tpu.memory_space<vmem>>, vector<1x1x128xf32>
    %3 = vector.shape_cast %2 : vector<1x1x128xf32> to vector<1x128xf32>
    %c0_i32 = arith.constant 0 : i32
    %4 = arith.index_cast %c0_i32 : i32 to index
    %c0_5 = arith.constant 0 : index
    %c0_6 = arith.constant 0 : index
    %5 = vector.load %arg2[%4, %c0_5, %c0_6] : memref<1x16x128xf32, #tpu.memory_space<vmem>>, vector<1x16x128xf32>
    %6 = vector.shape_cast %5 : vector<1x16x128xf32> to vector<16x128xf32>
    %cst = arith.constant dense<0.000000e+00> : vector<16xf32>
    %7 = vector.multi_reduction <add>, %6, %cst [1] : vector<16x128xf32> to vector<16xf32>
    %8 = vector.shape_cast %7 : vector<16xf32> to vector<16x1xf32>
    %cst_7 = arith.constant 1.280000e+02 : f32
    %9 = vector.broadcast %cst_7 : f32 to vector<16x1xf32>
    %10 = arith.divf %8, %9 : vector<16x1xf32>
    %11 = arith.mulf %6, %6 : vector<16x128xf32>
    %cst_8 = arith.constant dense<0.000000e+00> : vector<16xf32>
    %12 = vector.multi_reduction <add>, %11, %cst_8 [1] : vector<16x128xf32> to vector<16xf32>
    %13 = vector.shape_cast %12 : vector<16xf32> to vector<16x1xf32>
    %cst_9 = arith.constant 1.280000e+02 : f32
    %14 = vector.broadcast %cst_9 : f32 to vector<16x1xf32>
    %15 = arith.divf %13, %14 : vector<16x1xf32>
    %16 = arith.mulf %10, %10 : vector<16x1xf32>
    %17 = arith.subf %15, %16 : vector<16x1xf32>
    %cst_10 = arith.constant 0.000000e+00 : f32
    %18 = vector.broadcast %cst_10 : f32 to vector<16x1xf32>
    %19 = arith.maximumf %17, %18 : vector<16x1xf32>
    %20 = vector.broadcast %10 : vector<16x1xf32> to vector<16x128xf32>
    %21 = arith.subf %6, %20 : vector<16x128xf32>
    %cst_11 = arith.constant 9.99999974E-6 : f32
    %22 = vector.broadcast %cst_11 : f32 to vector<16x1xf32>
    %23 = arith.addf %19, %22 : vector<16x1xf32>
    %24 = math.rsqrt %23 : vector<16x1xf32>
    %25 = vector.broadcast %24 : vector<16x1xf32> to vector<16x128xf32>
    %26 = arith.mulf %21, %25 : vector<16x128xf32>
    %27 = vector.broadcast %1 : vector<1x128xf32> to vector<16x128xf32>
    %28 = arith.mulf %26, %27 : vector<16x128xf32>
    %29 = vector.broadcast %3 : vector<1x128xf32> to vector<16x128xf32>
    %30 = arith.addf %28, %29 : vector<16x128xf32>
    %31 = arith.index_cast %c0_i32 : i32 to index
    %c0_12 = arith.constant 0 : index
    %c0_13 = arith.constant 0 : index
    %32 = vector.load %arg8[%31, %c0_12, %c0_13] : memref<1x16x128xf32, #tpu.memory_space<vmem>>, vector<1x16x128xf32>
    %33 = vector.shape_cast %32 : vector<1x16x128xf32> to vector<16x128xf32>
    %34 = vector.shape_cast %30 : vector<16x128xf32> to vector<1x16x128xf32>
    tpu.vector_store %arg8[%31, %c0_12, %c0_13], %34 {strides = array<i32>} : memref<1x16x128xf32, #tpu.memory_space<vmem>>, vector<1x16x128xf32>,
    %35 = arith.index_cast %c0_i32 : i32 to index
    %c0_14 = arith.constant 0 : index
    %c0_15 = arith.constant 0 : index
    %36 = vector.load %arg8[%35, %c0_14, %c0_15] : memref<1x16x128xf32, #tpu.memory_space<vmem>>, vector<1x16x64xf32>
    %37 = vector.shape_cast %36 : vector<1x16x64xf32> to vector<16x64xf32>
    %c0_16 = arith.constant 0 : index
    %c0_17 = arith.constant 0 : index
    %c0_18 = arith.constant 0 : index
    %38 = vector.load %arg3[%c0_16, %c0_17, %c0_18] : memref<2x16x16xf32, #tpu.memory_space<vmem>>, vector<1x16x16xf32>
    %39 = vector.shape_cast %38 : vector<1x16x16xf32> to vector<16x16xf32>
    %cst_19 = arith.constant dense<0.000000e+00> : vector<16x64xf32>
    %40 = tpu.matmul %39, %37, %cst_19 {dimension_numbers = #tpu.dot_dimension_numbers<[1], [0], [0], [1], [0, 0, 1, 1], [], []>} : vector<16x16xf32>, vector<16x64xf32>, vector<16x64xf32> -> vector<16x64xf32>
    %41 = arith.index_cast %c0_i32 : i32 to index
    %c0_20 = arith.constant 0 : index
    %c64 = arith.constant 64 : index
    %42 = vector.load %arg8[%41, %c0_20, %c64] : memref<1x16x128xf32, #tpu.memory_space<vmem>>, vector<1x16x64xf32>
    %43 = vector.shape_cast %42 : vector<1x16x64xf32> to vector<16x64xf32>
    %c1 = arith.constant 1 : index
    %c0_21 = arith.constant 0 : index
    %c0_22 = arith.constant 0 : index
    %44 = vector.load %arg3[%c1, %c0_21, %c0_22] : memref<2x16x16xf32, #tpu.memory_space<vmem>>, vector<1x16x16xf32>
    %45 = vector.shape_cast %44 : vector<1x16x16xf32> to vector<16x16xf32>
    %cst_23 = arith.constant dense<0.000000e+00> : vector<16x64xf32>
    %46 = tpu.matmul %45, %43, %cst_23 {dimension_numbers = #tpu.dot_dimension_numbers<[1], [0], [0], [1], [0, 0, 1, 1], [], []>} : vector<16x16xf32>, vector<16x64xf32>, vector<16x64xf32> -> vector<16x64xf32>
    %47 = tpu.concatenate %40, %46 in 1 : vector<16x64xf32>, vector<16x64xf32> -> vector<16x128xf32>
    %c0_24 = arith.constant 0 : index
    %c0_25 = arith.constant 0 : index
    %c0_26 = arith.constant 0 : index
    %48 = vector.load %arg4[%c0_24, %c0_25, %c0_26] : memref<1x16x128xf32, #tpu.memory_space<vmem>>, vector<1x16x128xf32>
    %49 = vector.shape_cast %48 : vector<1x16x128xf32> to vector<16x128xf32>
    %50 = arith.addf %47, %49 : vector<16x128xf32>
    %51 = arith.index_cast %c0_i32 : i32 to index
    %c0_27 = arith.constant 0 : index
    %c0_28 = arith.constant 0 : index
    %52 = vector.load %arg1[%51, %c0_27, %c0_28] : memref<1x16x128xf32, #tpu.memory_space<vmem>>, vector<1x16x128xf32>
    %53 = vector.shape_cast %52 : vector<1x16x128xf32> to vector<16x128xf32>
    %54 = arith.mulf %50, %53 : vector<16x128xf32>
    %55 = arith.index_cast %c0_i32 : i32 to index
    %c0_29 = arith.constant 0 : index
    %c0_30 = arith.constant 0 : index
    %56 = vector.load %arg7[%55, %c0_29, %c0_30] : memref<1x16x128xf32, #tpu.memory_space<vmem>>, vector<1x16x128xf32>
    %57 = vector.shape_cast %56 : vector<1x16x128xf32> to vector<16x128xf32>
    %58 = vector.shape_cast %54 : vector<16x128xf32> to vector<1x16x128xf32>
    tpu.vector_store %arg7[%55, %c0_29, %c0_30], %58 {strides = array<i32>} : memref<1x16x128xf32, #tpu.memory_space<vmem>>, vector<1x16x128xf32>,
    %c1_i32 = arith.constant 1 : i32
    return
  }
  func.func @transform_0(%arg0: i32) -> (i32, i32, i32) {
    %c0_i32 = arith.constant 0 : i32
    %c0_i32_0 = arith.constant 0 : i32
    %c0_i32_1 = arith.constant 0 : i32
    return %arg0, %c0_i32, %c0_i32_0 : i32, i32, i32
  }
  func.func @transform_1(%arg0: i32) -> (i32, i32, i32) {
    %c0_i32 = arith.constant 0 : i32
    %c1_i32 = arith.constant 1 : i32
    %c0_i32_0 = arith.constant 0 : i32
    return %arg0, %c0_i32, %c1_i32 : i32, i32, i32
  }
  func.func @transform_2(%arg0: i32) -> (i32, i32, i32) {
    %c0_i32 = arith.constant 0 : i32
    %c0_i32_0 = arith.constant 0 : i32
    %c0_i32_1 = arith.constant 0 : i32
    %c0_i32_2 = arith.constant 0 : i32
    return %c0_i32, %c0_i32_0, %c0_i32_1 : i32, i32, i32
  }
  func.func @transform_3(%arg0: i32) -> (i32, i32, i32) {
    %c0_i32 = arith.constant 0 : i32
    %c0_i32_0 = arith.constant 0 : i32
    %c0_i32_1 = arith.constant 0 : i32
    %c0_i32_2 = arith.constant 0 : i32
    return %c0_i32, %c0_i32_0, %c0_i32_1 : i32, i32, i32
  }
  func.func @transform_4(%arg0: i32) -> (i32, i32, i32) {
    %c0_i32 = arith.constant 0 : i32
    %c0_i32_0 = arith.constant 0 : i32
    %c0_i32_1 = arith.constant 0 : i32
    %c0_i32_2 = arith.constant 0 : i32
    return %c0_i32, %c0_i32_0, %c0_i32_1 : i32, i32, i32
  }
  func.func @transform_5(%arg0: i32) -> (i32, i32, i32) {
    %c0_i32 = arith.constant 0 : i32
    %c0_i32_0 = arith.constant 0 : i32
    %c0_i32_1 = arith.constant 0 : i32
    %c0_i32_2 = arith.constant 0 : i32
    return %c0_i32, %c0_i32_0, %c0_i32_1 : i32, i32, i32
  }
  func.func @transform_6(%arg0: i32) -> (i32, i32, i32) {
    %c0_i32 = arith.constant 0 : i32
    %c0_i32_0 = arith.constant 0 : i32
    %c0_i32_1 = arith.constant 0 : i32
    return %arg0, %c0_i32, %c0_i32_0 : i32, i32, i32
  }
}

module attributes {stable_mosaic.version = 11 : i64} {
  func.func @sgu_kernel(%arg0: i32, %arg1: memref<1x16x128xf32, #tpu.memory_space<vmem>>, %arg2: memref<1x16x128xf32, #tpu.memory_space<vmem>>, %arg3: memref<2x16x16xf32, #tpu.memory_space<vmem>>, %arg4: memref<1x16x128xf32, #tpu.memory_space<vmem>>, %arg5: memref<1x1x128xf32, #tpu.memory_space<vmem>>, %arg6: memref<1x1x128xf32, #tpu.memory_space<vmem>>, %arg7: memref<1x16x128xf32, #tpu.memory_space<vmem>>, %arg8: memref<1x16x128xf32, #tpu.memory_space<vmem>>) attributes {dimension_semantics = [#tpu.dimension_semantics<parallel>], iteration_bounds = array<i64: 2>, scalar_prefetch = 0 : i64, scratch_operands = 1 : i64, tpu.core_type = #tpu.core_type<tc>, window_params = [{transform_indices = @transform_0, window_bounds = array<i64: 1, 16, 128>}, {transform_indices = @transform_1, window_bounds = array<i64: 1, 16, 128>}, {pipeline_mode = #tpu.pipeline_mode<synchronous>, transform_indices = @transform_2, window_bounds = array<i64: 2, 16, 16>}, {pipeline_mode = #tpu.pipeline_mode<synchronous>, transform_indices = @transform_3, window_bounds = array<i64: 1, 16, 128>}, {pipeline_mode = #tpu.pipeline_mode<synchronous>, transform_indices = @transform_4, window_bounds = array<i64: 1, 1, 128>}, {pipeline_mode = #tpu.pipeline_mode<synchronous>, transform_indices = @transform_5, window_bounds = array<i64: 1, 1, 128>}, {transform_indices = @transform_6, window_bounds = array<i64: 1, 16, 128>}]} {
    %c0 = arith.constant 0 : index
    %c0_0 = arith.constant 0 : index
    %c0_1 = arith.constant 0 : index
    %0 = vector.load %arg5[%c0, %c0_0, %c0_1] : memref<1x1x128xf32, #tpu.memory_space<vmem>>, vector<1x1x128xf32>
    %1 = vector.shape_cast %0 : vector<1x1x128xf32> to vector<1x128xf32>
    %c0_2 = arith.constant 0 : index
    %c0_3 = arith.constant 0 : index
    %c0_4 = arith.constant 0 : index
    %2 = vector.load %arg6[%c0_2, %c0_3, %c0_4] : memref<1x1x128xf32, #tpu.memory_space<vmem>>, vector<1x1x128xf32>
    %3 = vector.shape_cast %2 : vector<1x1x128xf32> to vector<1x128xf32>
    %c0_i32 = arith.constant 0 : i32
    %4 = arith.index_cast %c0_i32 : i32 to index
    %c0_5 = arith.constant 0 : index
    %c0_6 = arith.constant 0 : index
    %5 = vector.load %arg2[%4, %c0_5, %c0_6] : memref<1x16x128xf32, #tpu.memory_space<vmem>>, vector<1x16x128xf32>
    %6 = vector.shape_cast %5 : vector<1x16x128xf32> to vector<16x128xf32>
    %cst = arith.constant dense<0.000000e+00> : vector<16xf32>
    %7 = vector.multi_reduction <add>, %6, %cst [1] : vector<16x128xf32> to vector<16xf32>
    %8 = vector.shape_cast %7 : vector<16xf32> to vector<16x1xf32>
    %cst_7 = arith.constant 1.280000e+02 : f32
    %9 = vector.broadcast %cst_7 : f32 to vector<16x1xf32>
    %10 = arith.divf %8, %9 : vector<16x1xf32>
    %11 = arith.mulf %6, %6 : vector<16x128xf32>
    %cst_8 = arith.constant dense<0.000000e+00> : vector<16xf32>
    %12 = vector.multi_reduction <add>, %11, %cst_8 [1] : vector<16x128xf32> to vector<16xf32>
    %13 = vector.shape_cast %12 : vector<16xf32> to vector<16x1xf32>
    %cst_9 = arith.constant 1.280000e+02 : f32
    %14 = vector.broadcast %cst_9 : f32 to vector<16x1xf32>
    %15 = arith.divf %13, %14 : vector<16x1xf32>
    %16 = arith.mulf %10, %10 : vector<16x1xf32>
    %17 = arith.subf %15, %16 : vector<16x1xf32>
    %cst_10 = arith.constant 0.000000e+00 : f32
    %18 = vector.broadcast %cst_10 : f32 to vector<16x1xf32>
    %19 = arith.maximumf %17, %18 : vector<16x1xf32>
    %20 = vector.broadcast %10 : vector<16x1xf32> to vector<16x128xf32>
    %21 = arith.subf %6, %20 : vector<16x128xf32>
    %cst_11 = arith.constant 9.99999974E-6 : f32
    %22 = vector.broadcast %cst_11 : f32 to vector<16x1xf32>
    %23 = arith.addf %19, %22 : vector<16x1xf32>
    %24 = math.rsqrt %23 : vector<16x1xf32>
    %25 = vector.broadcast %24 : vector<16x1xf32> to vector<16x128xf32>
    %26 = arith.mulf %21, %25 : vector<16x128xf32>
    %27 = vector.broadcast %1 : vector<1x128xf32> to vector<16x128xf32>
    %28 = arith.mulf %26, %27 : vector<16x128xf32>
    %29 = vector.broadcast %3 : vector<1x128xf32> to vector<16x128xf32>
    %30 = arith.addf %28, %29 : vector<16x128xf32>
    %31 = arith.index_cast %c0_i32 : i32 to index
    %c0_12 = arith.constant 0 : index
    %c0_13 = arith.constant 0 : index
    %32 = vector.load %arg8[%31, %c0_12, %c0_13] : memref<1x16x128xf32, #tpu.memory_space<vmem>>, vector<1x16x128xf32>
    %33 = vector.shape_cast %32 : vector<1x16x128xf32> to vector<16x128xf32>
    %34 = vector.shape_cast %30 : vector<16x128xf32> to vector<1x16x128xf32>
    tpu.vector_store %arg8[%31, %c0_12, %c0_13], %34 {strides = array<i32>} : memref<1x16x128xf32, #tpu.memory_space<vmem>>, vector<1x16x128xf32>,
    %35 = arith.index_cast %c0_i32 : i32 to index
    %c0_14 = arith.constant 0 : index
    %c0_15 = arith.constant 0 : index
    %36 = vector.load %arg8[%35, %c0_14, %c0_15] : memref<1x16x128xf32, #tpu.memory_space<vmem>>, vector<1x16x64xf32>
    %37 = vector.shape_cast %36 : vector<1x16x64xf32> to vector<16x64xf32>
    %c0_16 = arith.constant 0 : index
    %c0_17 = arith.constant 0 : index
    %c0_18 = arith.constant 0 : index
    %38 = vector.load %arg3[%c0_16, %c0_17, %c0_18] : memref<2x16x16xf32, #tpu.memory_space<vmem>>, vector<1x16x16xf32>
    %39 = vector.shape_cast %38 : vector<1x16x16xf32> to vector<16x16xf32>
    %cst_19 = arith.constant dense<0.000000e+00> : vector<16x64xf32>
    %40 = tpu.matmul %39, %37, %cst_19 {dimension_numbers = #tpu.dot_dimension_numbers<[1], [0], [0], [1], [0, 0, 1, 1], [], []>} : vector<16x16xf32>, vector<16x64xf32>, vector<16x64xf32> -> vector<16x64xf32>
    %41 = arith.index_cast %c0_i32 : i32 to index
    %c0_20 = arith.constant 0 : index
    %c64 = arith.constant 64 : index
    %42 = vector.load %arg8[%41, %c0_20, %c64] : memref<1x16x128xf32, #tpu.memory_space<vmem>>, vector<1x16x64xf32>
    %43 = vector.shape_cast %42 : vector<1x16x64xf32> to vector<16x64xf32>
    %c1 = arith.constant 1 : index
    %c0_21 = arith.constant 0 : index
    %c0_22 = arith.constant 0 : index
    %44 = vector.load %arg3[%c1, %c0_21, %c0_22] : memref<2x16x16xf32, #tpu.memory_space<vmem>>, vector<1x16x16xf32>
    %45 = vector.shape_cast %44 : vector<1x16x16xf32> to vector<16x16xf32>
    %cst_23 = arith.constant dense<0.000000e+00> : vector<16x64xf32>
    %46 = tpu.matmul %45, %43, %cst_23 {dimension_numbers = #tpu.dot_dimension_numbers<[1], [0], [0], [1], [0, 0, 1, 1], [], []>} : vector<16x16xf32>, vector<16x64xf32>, vector<16x64xf32> -> vector<16x64xf32>
    %47 = tpu.concatenate %40, %46 in 1 : vector<16x64xf32>, vector<16x64xf32> -> vector<16x128xf32>
    %c0_24 = arith.constant 0 : index
    %c0_25 = arith.constant 0 : index
    %c0_26 = arith.constant 0 : index
    %48 = vector.load %arg4[%c0_24, %c0_25, %c0_26] : memref<1x16x128xf32, #tpu.memory_space<vmem>>, vector<1x16x128xf32>
    %49 = vector.shape_cast %48 : vector<1x16x128xf32> to vector<16x128xf32>
    %50 = arith.addf %47, %49 : vector<16x128xf32>
    %51 = arith.index_cast %c0_i32 : i32 to index
    %c0_27 = arith.constant 0 : index
    %c0_28 = arith.constant 0 : index
    %52 = vector.load %arg1[%51, %c0_27, %c0_28] : memref<1x16x128xf32, #tpu.memory_space<vmem>>, vector<1x16x128xf32>
    %53 = vector.shape_cast %52 : vector<1x16x128xf32> to vector<16x128xf32>
    %54 = arith.mulf %50, %53 : vector<16x128xf32>
    %55 = arith.index_cast %c0_i32 : i32 to index
    %c0_29 = arith.constant 0 : index
    %c0_30 = arith.constant 0 : index
    %56 = vector.load %arg7[%55, %c0_29, %c0_30] : memref<1x16x128xf32, #tpu.memory_space<vmem>>, vector<1x16x128xf32>
    %57 = vector.shape_cast %56 : vector<1x16x128xf32> to vector<16x128xf32>
    %58 = vector.shape_cast %54 : vector<16x128xf32> to vector<1x16x128xf32>
    tpu.vector_store %arg7[%55, %c0_29, %c0_30], %58 {strides = array<i32>} : memref<1x16x128xf32, #tpu.memory_space<vmem>>, vector<1x16x128xf32>,
    %c1_i32 = arith.constant 1 : i32
    return
  }
  func.func @transform_0(%arg0: i32) -> (i32, i32, i32) {
    %c0_i32 = arith.constant 0 : i32
    %c0_i32_0 = arith.constant 0 : i32
    %c0_i32_1 = arith.constant 0 : i32
    return %arg0, %c0_i32, %c0_i32_0 : i32, i32, i32
  }
  func.func @transform_1(%arg0: i32) -> (i32, i32, i32) {
    %c0_i32 = arith.constant 0 : i32
    %c1_i32 = arith.constant 1 : i32
    %c0_i32_0 = arith.constant 0 : i32
    return %arg0, %c0_i32, %c1_i32 : i32, i32, i32
  }
  func.func @transform_2(%arg0: i32) -> (i32, i32, i32) {
    %c0_i32 = arith.constant 0 : i32
    %c0_i32_0 = arith.constant 0 : i32
    %c0_i32_1 = arith.constant 0 : i32
    %c0_i32_2 = arith.constant 0 : i32
    return %c0_i32, %c0_i32_0, %c0_i32_1 : i32, i32, i32
  }
  func.func @transform_3(%arg0: i32) -> (i32, i32, i32) {
    %c0_i32 = arith.constant 0 : i32
    %c0_i32_0 = arith.constant 0 : i32
    %c0_i32_1 = arith.constant 0 : i32
    %c0_i32_2 = arith.constant 0 : i32
    return %c0_i32, %c0_i32_0, %c0_i32_1 : i32, i32, i32
  }
  func.func @transform_4(%arg0: i32) -> (i32, i32, i32) {
    %c0_i32 = arith.constant 0 : i32
    %c0_i32_0 = arith.constant 0 : i32
    %c0_i32_1 = arith.constant 0 : i32
    %c0_i32_2 = arith.constant 0 : i32
    return %c0_i32, %c0_i32_0, %c0_i32_1 : i32, i32, i32
  }
  func.func @transform_5(%arg0: i32) -> (i32, i32, i32) {
    %c0_i32 = arith.constant 0 : i32
    %c0_i32_0 = arith.constant 0 : i32
    %c0_i32_1 = arith.constant 0 : i32
    %c0_i32_2 = arith.constant 0 : i32
    return %c0_i32, %c0_i32_0, %c0_i32_1 : i32, i32, i32
  }
  func.func @transform_6(%arg0: i32) -> (i32, i32, i32) {
    %c0_i32 = arith.constant 0 : i32
    %c0_i32_0 = arith.constant 0 : i32
    %c0_i32_1 = arith.constant 0 : i32
    return %arg0, %c0_i32, %c0_i32_0 : i32, i32, i32
  }
}

</mosaic_0001>

<bundles_post_ra>
// kernel: tpu_custom_call.1
= control target key start
LH: loop header
LB: loop body
LE: loop exit
PB: predicated region body
PF: predicated region fallthrough
CT: control target
= control target key end

     0   :  { %s1419_s0 = inlined_call_operand.hbm [shape: f32[2,16,256], index: 0, kind: input, shape index: {}]   ;;  %s1420_s1 = inlined_call_operand.hbm [shape: f32[2,16,256], index: 1, kind: input, shape index: {}]   ;;  %s1421_s2 = inlined_call_operand.hbm [shape: f32[2,16,16], index: 2, kind: input, shape index: {}]   ;;  %s1422_s3 = inlined_call_operand.hbm [shape: f32[1,16,128], index: 3, kind: input, shape index: {}]   ;;  %s1423_s4 = inlined_call_operand.vmem [shape: f32[1,1,128], index: 4, kind: input, shape index: {}]   ;;  %s1424_s5 = inlined_call_operand.vmem [shape: f32[1,1,128], index: 5, kind: input, shape index: {}]   ;;  %s1425_s6 = inlined_call_operand.hbm [shape: f32[2,16,128], index: 6, kind: output, shape index: {}]  }
   0x1   :  { %1435 = sst [smem:[#allocation19_spill]] %s1419_s0 }
   0x2   :  { %1436 = sst [smem:[#allocation20_spill]] %s1421_s2 }
   0x3   :  { %1437 = sst [smem:[#allocation21_spill]] %s1422_s3 }
   0x4   :  { %11 = vsyncpa [#allocation4], 0 }
   0x5   :  { %13 = vsyncpa [#allocation4 + $0x1], 0 }
   0x6   :  { %14 = vsyncpa [#allocation7], 0 }
   0x7   :  { %16 = vsyncpa [#allocation7 + $0x1], 0 }
   0x8   :  { %17 = vsyncpa [#allocation10], 0 }
   0x9   :  { %18 = vsyncpa [#allocation5], 0 }
   0xa   :  { %20 = vsyncpa [#allocation5 + $0x1], 0  ;;  %s1112_s21 = smov 0   ;;  %s1114_s22 = smov 0  }
   0xb   :  { %s1116_s23 = smov 0   ;;  %s1118_s24 = smov 0  }
   0xc LB: > { %1438 = sst [smem:[#allocation17_spill]] %s1060_s23  ;;  %s1133_s25 = sadd.s32 4294967295, %s1064_s24   ;;  %s1064_s24 = sphi %s1118_s24, %s1468_s24   ;;  %s1060_s23 = sphi %s1116_s23, %s1465_s23   ;;  %s1056_s22 = sphi %s1114_s22, %s1467_s22   ;;  %s1052_s21 = sphi %s1112_s21, %s1466_s21  }
   0xd   : > { %s721_s26 = sadd.s32 4294967294, %s1064_s24   ;;  %s1137_s27 = sadd.s32 1, %s1064_s24  }
   0xe   : > { %s33_s28 = sadd.s32 1, %s1060_s23  ;;  %s30_s29 = ssub.s32 %s1064_s24, %s1137_s27 }
   0xf   : > { %p40_p0 = scmp.ne.s32.totalorder %s1060_s23, %s1056_s22  ;;  %p31_p1 = scmp.eq.s32.totalorder %s30_s29, 0 }
  0x10   : > { %p41_p2 = scmp.eq.s32.totalorder %s1064_s24, 0  ;;  %p46_p3 = scmp.ne.s32.totalorder %s1056_s22, %s1052_s21 }
  0x11   : > { %p1426_p4 = scmp.eq.s32.totalorder %s1133_s25, 0  ;;  %p180_p7 = scmp.eq.s32.totalorder %s1133_s25, 1 }
  0x12   : > { %s1149_s30 = scalar_select %p31_p1, %s1060_s23, %s33_s28  }
  0x13   : > { %p1151_p5 = por %p41_p2, %p40_p0  ;;  %p1157_p6 = por %p1426_p4, %p46_p3 }
  0x14   : > { %1439 = sst [smem:[#allocation18_spill]] %s1149_s30  ;;  %p186_p8 = scmp.eq.s32.totalorder %s721_s26, 1 }
  0x15   : > { %s1440_s7 = scalar_select %p1151_p5, 1, 0 }
  0x16   : > { %s1441_s8 = scalar_select %p1157_p6, 1, 0 }
  0x17   : > { %p722_p9 = scmp.ge.s32.totalorder %s1064_s24, 1  ;;  %p193_p10 = scmp.lt.s32.totalorder %s1064_s24, 3 }
  0x18   : > { %p1164_p11 = por %p180_p7, %p40_p0  ;;  %p1168_p12 = por %p186_p8, %p46_p3 }
  0x19   : > { %p1172_p13 = pnand %p722_p9, %p193_p10  ;;  %s1066_s12 = smov [#allocation8]  }
  0x1a   : > { %s1442_s9 = scalar_select %p1164_p11, 1, 0 }
  0x1b   : > { %s1443_s10 = scalar_select %p1168_p12, 1, 0 }
  0x1c   : > { %s1444_s11 = scalar_select %p1172_p13, 1, 0 }
  0x1d   : > { %p796_p1 = pneg %p1172_p13  ;;  %s205_s13 = sshll.u32 %s1066_s12, 4  ;;  %s206_s13 = int_to_ptr.vmem [resolvable:$true] %s205_s13 }
  0x1e   : > { %s1067_s15 = smov [#allocation9]   ;;  %s1446_s2 = sld [smem:[#allocation20_spill]] }
  0x1f   : > { %p1180_p2 = pnand %p796_p1, %p1426_p4  ;;  %s218_s16 = sshll.u32 %s1067_s15, 4  ;;  %s219_s16 = int_to_ptr.vmem [resolvable:$true] %s218_s16 }
  0x21   : > { %p871_p8 = pneg %p1180_p2 }
  0x24   : > { %s869_s19 = scalar_lea.hbm %s1446_s2, 512 }
  0x25   : > { %p870_p7 = scmp.ne.s32.totalorder %s1446_s2, %s869_s19  ;;  %p876_p1 = scmp.lt.u32.totalorder %s869_s19, %s1446_s2 }
  0x27   : > { %p872_p9 = pnand %p871_p8, %p870_p7 }
  0x29   : > { %p873_p10 = pneg %p872_p9 }
  0x2b   : > { %p878_p0 = pnand %p876_p1, %p873_p10 }
  0x2d   : > { %881 = shalt.err (!%p878_p0)
}
  0x2e   : > { %s882_s12 = scalar_lea.vmem %s206_s13, 512  ;;  %p890_p11 = scmp.lt.s32.totalorder %s206_s13, %s206_s13 }
  0x2f   : > { %p883_p4 = scmp.ne.s32.totalorder %s206_s13, %s882_s12  ;;  %p891_p6 = scmp.lt.s32.totalorder %s882_s12, %s882_s12 }
  0x31   : > { %p885_p3 = pnand %p883_p4, %p871_p8  ;;  %p892_p13 = por %p891_p6, %p890_p11 }
  0x33   : > { %p886_p12 = pneg %p885_p3 }
  0x35   : > { %p893_p5 = pnand %p892_p13, %p886_p12 }
  0x37   : > { %896 = shalt.err (!%p893_p5)
}
  0x38   : > { %s1432_s15 = smov 128   ;;  %s1069_s17 = smov 8  }
  0x39   : > { %799 = dma.hbm_to_vmem [thread:$0]  (!%p1180_p2), %s1446_s2, 512, %s206_s13, [#allocation7], %s1432_s15, %s1432_s15, %s1069_s17  }
  0x3a   : > { %p1447_p4 = scmp.ne.s32.totalorder %s1440_s7, 0  ;;  %p1448_p0 = scmp.lt.s32.totalorder %s1064_s24, 2 }
  0x3b   : > { %s1450_s3 = sld [smem:[#allocation21_spill]] }
  0x3c   : > { %p1215_p3 = pnand %p1448_p0, %p1447_p4 }
  0x3e   : > { %s1449_s20 = scalar_select %p1215_p3, 1, 0 }
  0x41   : > { %s897_s29 = scalar_lea.hbm %s1450_s3, 256 }
  0x42   : > { %p898_p5 = scmp.ne.s32.totalorder %s1450_s3, %s897_s29  ;;  %p904_p12 = scmp.lt.u32.totalorder %s897_s29, %s1450_s3 }
  0x44   : > { %p900_p6 = pnand %p898_p5, %p871_p8 }
  0x46   : > { %p901_p11 = pneg %p900_p6 }
  0x48   : > { %p906_p13 = pnand %p904_p12, %p901_p11 }
  0x4a   : > { %909 = shalt.err (!%p906_p13)
}
  0x4b   : > { %s910_s18 = scalar_lea.vmem %s219_s16, 256  ;;  %p918_p1 = scmp.lt.s32.totalorder %s219_s16, %s219_s16 }
  0x4c   : > { %p911_p7 = scmp.ne.s32.totalorder %s219_s16, %s910_s18  ;;  %p919_p4 = scmp.lt.s32.totalorder %s910_s18, %s910_s18 }
  0x4e   : > { %p913_p9 = pnand %p911_p7, %p871_p8  ;;  %p920_p0 = por %p919_p4, %p918_p1 }
  0x50   : > { %p914_p10 = pneg %p913_p9 }
  0x52   : > { %p921_p3 = pnand %p920_p0, %p914_p10 }
  0x54   : > { %924 = shalt.err (!%p921_p3)
}
  0x55   : > { %802 = dma.hbm_to_vmem [thread:$0]  (!%p1180_p2), %s1450_s3, 256, %s219_s16, [#allocation10], %s1432_s15, %s1432_s15, %s1069_s17  }
  0x56   : > { %s238_s26 = sand.u32 1, %s1060_s23   ;;  %s1431_s29 = sshll.u32 %s1064_s24, 9 }
  0x57   : > { %s1243_s28 = sshll.u32 %s238_s26, 4  ;;  %s1451_s0 = sld [smem:[#allocation19_spill]] }
  0x58   : > { %s242_s7 = scalar_lea.vmem [#allocation3], %s1243_s28  ;;  %s1256_s16 = scalar_lea.sflag [#allocation4], %s238_s26 }
  0x59   : > { %s249_s18 = sshll.u32 %s242_s7, 4  ;;  %p1452_p8 = scmp.ne.s32.totalorder %s1449_s20, 0  ;;  %s1254_s18 = int_to_ptr.vmem [resolvable:$true] %s249_s18 }
  0x5b   : > { %p927_p3 = pneg %p1452_p8 }
  0x5d   : > { %s1251_s13 = scalar_lea.hbm %s1451_s0, %s1431_s29  ;;  %s930_s14 = scalar_lea.hbm %s1451_s0, 1024 }
  0x5e   : > { %s925_s30 = scalar_lea.hbm %s1251_s13, 256  ;;  %p931_p11 = scmp.lt.u32.totalorder %s1251_s13, %s1451_s0 }
  0x5f   : > { %p926_p2 = scmp.ne.s32.totalorder %s1251_s13, %s925_s30  ;;  %p932_p12 = scmp.lt.u32.totalorder %s930_s14, %s925_s30 }
  0x60   : > { %p934_p7 = scmp.lt.u32.totalorder %s925_s30, %s1251_s13 }
  0x61   : > { %p928_p5 = pnand %p927_p3, %p926_p2  ;;  %p933_p13 = por %p932_p12, %p931_p11 }
  0x63   : > { %p929_p6 = pneg %p928_p5  ;;  %p935_p9 = por %p934_p7, %p933_p13 }
  0x65   : > { %p936_p10 = pnand %p935_p9, %p929_p6 }
  0x67   : > { %939 = shalt.err (!%p936_p10)
}
  0x68   : > { %s940_s26 = scalar_lea.vmem %s1254_s18, 256  ;;  %s1070_s7 = smov [#allocation3]  }
  0x69   : > { %p941_p1 = scmp.ne.s32.totalorder %s1254_s18, %s940_s26  ;;  %s945_s19 = sshll.u32 %s1070_s7, 4  ;;  %s946_s19 = int_to_ptr.vmem [resolvable:$false] %s945_s19 }
  0x6a   : > { %s947_s15 = scalar_lea.vmem %s946_s19, 512  ;;  %p948_p2 = scmp.lt.s32.totalorder %s1254_s18, %s946_s19 }
  0x6b   : > { %p943_p4 = pnand %p941_p1, %p927_p3  ;;  %p949_p5 = scmp.lt.s32.totalorder %s947_s15, %s940_s26 }
  0x6d   : > { %p944_p0 = pneg %p943_p4  ;;  %p950_p11 = por %p949_p5, %p948_p2 }
  0x6f   : > { %p951_p12 = pnand %p950_p11, %p944_p0 }
  0x71   : > { %954 = shalt.err (!%p951_p12)
}
  0x72   : > { %s1071_s29 = smov 256   ;;  %s1453_s30 = smov 128  }
  0x73   : > { %806 = dma.hbm_to_vmem [thread:$0]  (!%p1452_p8), %s1251_s13, 256, %s1254_s18, %s1256_s16, %s1071_s29, %s1453_s30, %s1069_s17  }
  0x74   : > { %s1454_s12 = sshll.u32 %s1064_s24, 9  ;;  %s263_s15 = scalar_lea.vmem [#allocation6], %s1243_s28 }
  0x75   : > { %s645_s7 = scalar_lea.hbm %s1420_s1, %s1454_s12  ;;  %s271_s0 = sshll.u32 %s263_s15, 4  ;;  %s1295_s0 = int_to_ptr.vmem [resolvable:$true] %s271_s0 }
  0x76   : > { %s1292_s19 = scalar_lea.hbm %s645_s7, 128  ;;  %s259_s2 = sand.u32 1, %s1064_s24  }
  0x77   : > { %s1298_s3 = scalar_lea.sflag [#allocation7], %s259_s2  ;;  %s985_s23 = scalar_lea.hbm %s645_s7, 384 }
  0x78   : > { %p956_p6 = scmp.ne.s32.totalorder %s1292_s19, %s985_s23  ;;  %s960_s16 = scalar_lea.hbm %s1420_s1, 1024 }
  0x79   : > { %p961_p9 = scmp.lt.u32.totalorder %s1292_s19, %s1420_s1  ;;  %p962_p10 = scmp.lt.u32.totalorder %s960_s16, %s985_s23 }
  0x7a   : > { %p958_p13 = pnand %p956_p6, %p927_p3  ;;  %p964_p4 = scmp.lt.u32.totalorder %s985_s23, %s1292_s19 }
  0x7b   : > { %p963_p1 = por %p962_p10, %p961_p9 }
  0x7c   : > { %p959_p7 = pneg %p958_p13 }
  0x7d   : > { %p965_p0 = por %p964_p4, %p963_p1 }
  0x7f   : > { %p966_p2 = pnand %p965_p0, %p959_p7 }
  0x81   : > { %969 = shalt.err (!%p966_p2)
}
  0x82   : > { %s970_s2 = scalar_lea.vmem %s1295_s0, 256  ;;  %s1072_s28 = smov [#allocation6]  }
  0x83   : > { %p971_p5 = scmp.ne.s32.totalorder %s1295_s0, %s970_s2  ;;  %s975_s26 = sshll.u32 %s1072_s28, 4  ;;  %s976_s26 = int_to_ptr.vmem [resolvable:$false] %s975_s26 }
  0x84   : > { %s977_s7 = scalar_lea.vmem %s976_s26, 512  ;;  %p978_p6 = scmp.lt.s32.totalorder %s1295_s0, %s976_s26 }
  0x85   : > { %p973_p11 = pnand %p971_p5, %p927_p3  ;;  %p979_p13 = scmp.lt.s32.totalorder %s977_s7, %s970_s2 }
  0x87   : > { %p974_p12 = pneg %p973_p11  ;;  %p980_p9 = por %p979_p13, %p978_p6 }
  0x89   : > { %p981_p10 = pnand %p980_p9, %p974_p12 }
  0x8b   : > { %984 = shalt.err (!%p981_p10)
}
  0x8c   : > { %809 = dma.hbm_to_vmem [thread:$0]  (!%p1452_p8), %s1292_s19, 256, %s1295_s0, %s1298_s3, %s1071_s29, %s1453_s30, %s1069_s17  }
  0x8d   : > { %p1455_p3 = scmp.ne.s32.totalorder %s1444_s11, 0 }
  0x8e   : > { %s1329_s23 = sand.u32 (!%p1455_p3), 1, %s1056_s22   ;;  %p1456_p7 = scmp.ne.s32.totalorder (!%p1455_p3), %s1441_s8, 0 }
  0x8f   : > { %283 = sbr.rel (%p1455_p3) target bundleno = 812 (0x32c), region = 44  ;;  %s1332_s15 = sshll.u32 (!%p1455_p3), %s1329_s23, 4 }
  0x90   : > { %s286_s20 = scalar_lea.sflag (!%p1455_p3), [#allocation4], %s1329_s23  ;;  %s289_s13 = scalar_lea.vmem (!%p1455_p3), [#allocation3], %s1332_s15 }
  0x96   : > { %1031 = dma.done.wait (%p1456_p7), %s286_s20, 256  }
  0x97   : > { %1033 = vsyncadd (%p1456_p7), %s286_s20, 4294967040  ;;  %s294_s0 = sand.u32 1, %s1133_s25   ;;  %s298_s11 = scalar_lea.vmem [#allocation6], %s1332_s15 }
  0x98   : > { %s295_s3 = scalar_lea.sflag [#allocation7], %s294_s0 }
  0x99   : > { %1035 = dma.done.wait (%p1456_p7), %s295_s3, 256  }
  0x9a   : > { %1037 = vsyncadd (%p1456_p7), %s295_s3, 4294967040  ;;  %p1457_p8 = scmp.eq.s32.totalorder %s1133_s25, 0 }
  0x9c   : > { %1039 = dma.done.wait (%p1457_p8), [#allocation7], 512   ;;  %p1458_p1 = pmov %p1457_p8 }
  0x9e   : > { %1041 = vsyncadd (%p1458_p1), [#allocation7], 4294966784  ;;  %p1459_p4 = pmov %p1458_p1 }
  0x9f   : > { %p1460_p0 = pmov %p1458_p1 }
  0xa0   : > { %1043 = dma.done.wait (%p1459_p4), [#allocation10], 256  }
  0xa1   : > { %1045 = vsyncadd (%p1460_p0), [#allocation10], 4294967040  ;;  %v342_v0 = vld [vmem:[%s298_s11] sm:$0xff]  ;;  %v343_v1 = vld [vmem:[%s298_s11 + $0x8] sm:$0xff]  ;;  %vm395_vm0 = vcmask 130048   ;;  %s1073_s19 = smov 64  }
  0xa2   : > { %344 = vadd.xlane.f32.xlu0 %v342_v0  ;;  %v351_v2 = vmul.f32 %v342_v0, %v342_v0  ;;  %v352_v3 = vmul.f32 %v343_v1, %v343_v1  ;;  %v738_v23 = vld [vmem:[%s1423_s4] ss:$0 sm:$0xff]  ;;  %v478_v28 = vld [vmem:[#allocation8 + $0x10] sm:$0xff]  ;;  %v394_v36 = vld [vmem:[#allocation8 + $0x8] sm:$0xff]  ;;  %vm577_vm1 = vcmask 523264   ;;  %s339_s18 = scalar_lea.vmem [#allocation11], %s1332_s15 }
  0xa3   : > { %v739_v29 = vld [vmem:[%s1424_s5] ss:$0 sm:$0xff]  ;;  %771 = vmatprep.mubr.msk.f32.mxu1 %vm395_vm0, %v478_v28  ;;  %v479_v41 = vld [vmem:[#allocation8 + $0x18] sm:$0xff]  ;;  %s604_s16 = sshll.u32 %s339_s18, 4  ;;  %v581_v51 = vld [vmem:[#allocation9 + $0x8] sm:$0xff]  ;;  %s751_s12 = sshll.u32 %s1133_s25, 8  ;;  %s1370_s16 = int_to_ptr.vmem [resolvable:$true] %s604_s16 }
  0xa4   : > { %353 = vadd.xlane.f32.xlu1 %v351_v2  ;;  %v393_v31 = vld [vmem:[#allocation8] sm:$0xff]  ;;  %v585_v54 = vld [vmem:[%s289_s13 + $0x8] sm:$0xff]  ;;  %s1375_s28 = scalar_lea.hbm %s1425_s6, %s751_s12  ;;  %s591_s26 = scalar_lea.sflag [#allocation5], %s1329_s23 }
  0xa5   : > { %764 = vmatprep.mubr.msk.f32.mxu0 %vm395_vm0, %v393_v31  ;;  %v580_v46 = vld [vmem:[#allocation9] sm:$0xff]  ;;  %s986_s7 = scalar_lea.vmem %s1370_s16, 256  ;;  %p1461_p5 = scmp.ne.s32.totalorder %s1442_s9, 0 }
  0xa6   : > { %346 = vadd.xlane.f32.xlu0 %v343_v1  ;;  %v584_v49 = vld [vmem:[%s289_s13] sm:$0xff]  ;;  %p987_p2 = scmp.ne.s32.totalorder %s1370_s16, %s986_s7  ;;  %s1074_s25 = smov [#allocation11]  }
  0xa7   : > { %s990_s15 = sshll.u32 %s1074_s25, 4  ;;  %s991_s15 = int_to_ptr.vmem [resolvable:$false] %s990_s15 }
  0xa8   : > { %355 = vadd.xlane.f32.xlu1 %v352_v3  ;;  %p988_p11 = pnand %p987_p2, %p1461_p5  ;;  %s992_s20 = scalar_lea.vmem %s991_s15, 512 }
  0xa9   : > { %p993_p6 = scmp.lt.s32.totalorder %s1370_s16, %s991_s15  ;;  %p994_p13 = scmp.lt.s32.totalorder %s992_s20, %s986_s7 }
  0xaa   : > { %p989_p12 = pneg %p988_p11 }
  0xab   : > { %p995_p9 = por %p994_p13, %p993_p6 }
  0xad   : > { %p996_p10 = pnand %p995_p9, %p989_p12 }
 0x12f   : > { %v345_v4 = vpop.xlane.xlu0 %344 }
 0x130   : > { %v349_v5 = vmul.f32 0.0078125, %v345_v4 }
 0x131   : > { %v354_v6 = vpop.xlane.xlu1 %353 }
 0x132   : > { %v359_v7 = vmul.f32 %v349_v5, %v349_v5  ;;  %v357_v8 = vmul.f32 0.0078125, %v354_v6  ;;  %v365_v20 = vsub.f32 %v342_v0, %v349_v5 }
 0x133   : > { %v347_v9 = vpop.xlane.xlu0 %346 }
 0x134   : > { %v361_v10 = vsub.f32 %v357_v8, %v359_v7  ;;  %v350_v11 = vmul.f32 0.0078125, %v347_v9 }
 0x135   : > { %v356_v12 = vpop.xlane.xlu1 %355 }
 0x136   : > { %v363_v13 = vmax.f32 %v361_v10, 0.0  ;;  %v360_v14 = vmul.f32 %v350_v11, %v350_v11  ;;  %v358_v15 = vmul.f32 0.0078125, %v356_v12  ;;  %v366_v24 = vsub.f32 %v343_v1, %v350_v11 }
 0x138   : > { %v367_v16 = vadd.f32 1e-05, %v363_v13  ;;  %v362_v17 = vsub.f32 %v358_v15, %v360_v14 }
 0x13a   : > { %865 = vrsqrt.f32 %v367_v16  ;;  %v364_v18 = vmax.f32 %v362_v17, 0.0 }
 0x13c   : > { %v368_v19 = vadd.f32 1e-05, %v364_v18 }
 0x13e   : > { %867 = vrsqrt.f32 %v368_v19 }
 0x144   : > { %v866_v21 = vpop.eup %865 }
 0x145   : > { %v371_v22 = vmul.f32 %v866_v21, %v365_v20 }
 0x147   : > { %v379_v27 = vmul.f32 %v738_v23, %v371_v22 }
 0x148   : > { %v868_v25 = vpop.eup %867 }
 0x149   : > { %v372_v26 = vmul.f32 %v868_v25, %v366_v24  ;;  %v387_v32 = vadd.f32 %v739_v29, %v379_v27 }
 0x14b   : > { %v380_v30 = vmul.f32 %v738_v23, %v372_v26 }
 0x14d   : > { %v388_v33 = vadd.f32 %v739_v29, %v380_v30 }
 0x14f   : > { %v860_v34 = vpack.i.bf16 %v388_v33, %v387_v32  ;;  %v774_v35 = vpack.c.bf16 %v388_v33, %v387_v32 }
 0x151   : > { %861 = vrot.lane.b32.xlu0 %v860_v34, %s1073_s19  ;;  %775 = vmatprep.subr.bf16.mxu0 %v774_v35 }
 0x152   : > { %777 = vmatpush3.bf16.msra.mxu0 %v774_v35 }
 0x155   : > { %765 = vmatmul.mubr.msk.f32.vlgmr.msra.gmra.mrb[0].mxu0 %vm395_vm0, %v394_v36 }
 0x1c3   : > { %v862_v37 = vpop.permute.xlu0 %861 }
 0x1c4   : > { %v864_v38 = vunpack.i.h.bf16 %v862_v37  ;;  %v863_v39 = vunpack.i.l.bf16 %v862_v37 }
 0x1c6   : > { %v778_v40 = vpack.c.bf16 %v864_v38, %v863_v39 }
 0x1c8   : > { %779 = vmatprep.subr.bf16.mxu1 %v778_v40 }
 0x1c9   : > { %781 = vmatpush3.bf16.msra.mxu1 %v778_v40 }
 0x1cc   : > { %772 = vmatmul.mubr.msk.f32.vlgmr.msra.gmra.mrb[0].mxu1 %vm395_vm0, %v479_v41 }
 0x228   : > { %v766_v42 = vpop.f32.mrb[0].mxu0 }
 0x229   : > { %v468_v43 = vpop.f32.mrb[1].mxu0 }
 0x29f   : > { %v773_v44 = vpop.f32.mrb[0].mxu1 }
 0x2a0   : > { %v560_v45 = vpop.f32.mrb[1].mxu1 }
 0x2a1   : > { %571 = vrot.lane.b32.xlu1 %v560_v45, %s1073_s19 }
 0x2a5   : > { %573 = vrot.lane.b32.xlu1 %v773_v44, %s1073_s19 }
 0x313   : > { %v572_v47 = vpop.permute.xlu1 %571 }
 0x314   : > { %v578_v48 = vsel %vm577_vm1, %v468_v43, %v572_v47 }
 0x315   : > { %v582_v50 = vadd.f32 %v580_v46, %v578_v48 }
 0x317   : > { %v586_v52 = vmul.f32 %v584_v49, %v582_v50  ;;  %v574_v53 = vpop.permute.xlu1 %573 }
 0x318   : > { %v579_v55 = vsel %vm577_vm1, %v766_v42, %v574_v53 }
 0x319   : > { %588 = vst [vmem:[%s339_s18] sm:$0xff] %v586_v52  ;;  %v583_v56 = vadd.f32 %v581_v51, %v579_v55 }
 0x31b   : > { %v587_v57 = vmul.f32 %v585_v54, %v583_v56 }
 0x31d   : > { %589 = vst [vmem:[%s339_s18 + $0x8] sm:$0xff] %v587_v57 }
 0x31e   : > { %999 = shalt.err (!%p996_p10)
}
 0x31f   : > { %s1000_s13 = scalar_lea.hbm %s1375_s28, 256  ;;  %s1004_s11 = scalar_lea.hbm %s1425_s6, 512 }
 0x320   : > { %p1001_p3 = scmp.ne.s32.totalorder %s1375_s28, %s1000_s13  ;;  %p1005_p1 = scmp.lt.u32.totalorder %s1375_s28, %s1425_s6 }
 0x321   : > { %p1006_p4 = scmp.lt.u32.totalorder %s1004_s11, %s1000_s13  ;;  %p1008_p2 = scmp.lt.u32.totalorder %s1000_s13, %s1375_s28 }
 0x322   : > { %p1002_p7 = pnand %p1001_p3, %p1461_p5 }
 0x323   : > { %p1007_p0 = por %p1006_p4, %p1005_p1 }
 0x324   : > { %p1003_p8 = pneg %p1002_p7 }
 0x325   : > { %p1009_p11 = por %p1008_p2, %p1007_p0 }
 0x327   : > { %p1010_p12 = pnand %p1009_p11, %p1003_p8 }
 0x329   : > { %1013 = shalt.err (!%p1010_p12)
}
 0x32a   : > { %s1075_s29 = smov 128   ;;  %s1076_s30 = smov 8  }
 0x32b   : > { %794 = dma.vmem_to_hbm [thread:$0]  (%p1461_p5), %s1370_s16, 256, %s1375_s28, %s591_s26, %s1075_s29, %s1075_s29, %s1076_s30  }
 0x32c PF: > { %s619_s19 = sand.u32 1, %s1052_s21   ;;  %p1462_p6 = scmp.ne.s32.totalorder %s1443_s10, 0 }
 0x32d   : > { %p1463_p13 = scmp.ge.s32.totalorder %s1064_s24, 2  ;;  %s620_s18 = scalar_lea.sflag [#allocation5], %s619_s19 }
 0x32f   : > { %p811_p9 = pnand %p1463_p13, %p1462_p6 }
 0x331   : > { %1047 = dma.done.wait (!%p811_p9), %s620_s18, 256  }
 0x332   : > { %1049 = vsyncadd (!%p811_p9), %s620_s18, 4294967040  ;;  %s1464_s12 = sld [smem:[#allocation17_spill]]  ;;  %s1465_s23 = sld [smem:[#allocation18_spill]] }
 0x333   : > { %p23_p10 = scmp.ge.s32.totalorder %s1137_s27, 4   ;;  %s1466_s21 = smov %s1056_s22 }
 0x334   : > { %s1468_s24 = smov %s1137_s27 }
 0x335   :  { %25 = sbr.rel (!%p23_p10) target bundleno = 12 (0xc), region = 111 }
 0x338   : > { %s1467_s22 = smov %s1464_s12 }
 0x33c   :  { %625 = vsyncpa [#allocation4], 1 }
 0x33d   :  { %627 = vsyncpa [#allocation4 + $0x1], 1 }
 0x33e   :  { %628 = vsyncpa [#allocation7], 1 }
 0x33f   :  { %630 = vsyncpa [#allocation7 + $0x1], 1 }
 0x340   :  { %631 = vsyncpa [#allocation10], 1 }
 0x341   :  { %632 = vsyncpa [#allocation5], 1 }
 0x342   :  { %634 = vsyncpa [#allocation5 + $0x1], 1 }

// kernel: tpu_custom_call.1
= control target key start
LH: loop header
LB: loop body
LE: loop exit
PB: predicated region body
PF: predicated region fallthrough
CT: control target
= control target key end

     0   :  { %s1419_s0 = inlined_call_operand.hbm [shape: f32[2,16,256], index: 0, kind: input, shape index: {}]   ;;  %s1420_s1 = inlined_call_operand.hbm [shape: f32[2,16,256], index: 1, kind: input, shape index: {}]   ;;  %s1421_s2 = inlined_call_operand.hbm [shape: f32[2,16,16], index: 2, kind: input, shape index: {}]   ;;  %s1422_s3 = inlined_call_operand.hbm [shape: f32[1,16,128], index: 3, kind: input, shape index: {}]   ;;  %s1423_s4 = inlined_call_operand.vmem [shape: f32[1,1,128], index: 4, kind: input, shape index: {}]   ;;  %s1424_s5 = inlined_call_operand.vmem [shape: f32[1,1,128], index: 5, kind: input, shape index: {}]   ;;  %s1425_s6 = inlined_call_operand.hbm [shape: f32[2,16,128], index: 6, kind: output, shape index: {}]  }
   0x1   :  { %1435 = sst [smem:[#allocation19_spill]] %s1419_s0 }
   0x2   :  { %1436 = sst [smem:[#allocation20_spill]] %s1421_s2 }
   0x3   :  { %1437 = sst [smem:[#allocation21_spill]] %s1422_s3 }
   0x4   :  { %11 = vsyncpa [#allocation4], 0 }
   0x5   :  { %13 = vsyncpa [#allocation4 + $0x1], 0 }
   0x6   :  { %14 = vsyncpa [#allocation7], 0 }
   0x7   :  { %16 = vsyncpa [#allocation7 + $0x1], 0 }
   0x8   :  { %17 = vsyncpa [#allocation10], 0 }
   0x9   :  { %18 = vsyncpa [#allocation5], 0 }
   0xa   :  { %20 = vsyncpa [#allocation5 + $0x1], 0  ;;  %s1112_s21 = smov 0   ;;  %s1114_s22 = smov 0  }
   0xb   :  { %s1116_s23 = smov 0   ;;  %s1118_s24 = smov 0  }
   0xc LB: > { %1438 = sst [smem:[#allocation17_spill]] %s1060_s23  ;;  %s1133_s25 = sadd.s32 4294967295, %s1064_s24   ;;  %s1064_s24 = sphi %s1118_s24, %s1468_s24   ;;  %s1060_s23 = sphi %s1116_s23, %s1465_s23   ;;  %s1056_s22 = sphi %s1114_s22, %s1467_s22   ;;  %s1052_s21 = sphi %s1112_s21, %s1466_s21  }
   0xd   : > { %s721_s26 = sadd.s32 4294967294, %s1064_s24   ;;  %s1137_s27 = sadd.s32 1, %s1064_s24  }
   0xe   : > { %s33_s28 = sadd.s32 1, %s1060_s23  ;;  %s30_s29 = ssub.s32 %s1064_s24, %s1137_s27 }
   0xf   : > { %p40_p0 = scmp.ne.s32.totalorder %s1060_s23, %s1056_s22  ;;  %p31_p1 = scmp.eq.s32.totalorder %s30_s29, 0 }
  0x10   : > { %p41_p2 = scmp.eq.s32.totalorder %s1064_s24, 0  ;;  %p46_p3 = scmp.ne.s32.totalorder %s1056_s22, %s1052_s21 }
  0x11   : > { %p1426_p4 = scmp.eq.s32.totalorder %s1133_s25, 0  ;;  %p180_p7 = scmp.eq.s32.totalorder %s1133_s25, 1 }
  0x12   : > { %s1149_s30 = scalar_select %p31_p1, %s1060_s23, %s33_s28  }
  0x13   : > { %p1151_p5 = por %p41_p2, %p40_p0  ;;  %p1157_p6 = por %p1426_p4, %p46_p3 }
  0x14   : > { %1439 = sst [smem:[#allocation18_spill]] %s1149_s30  ;;  %p186_p8 = scmp.eq.s32.totalorder %s721_s26, 1 }
  0x15   : > { %s1440_s7 = scalar_select %p1151_p5, 1, 0 }
  0x16   : > { %s1441_s8 = scalar_select %p1157_p6, 1, 0 }
  0x17   : > { %p722_p9 = scmp.ge.s32.totalorder %s1064_s24, 1  ;;  %p193_p10 = scmp.lt.s32.totalorder %s1064_s24, 3 }
  0x18   : > { %p1164_p11 = por %p180_p7, %p40_p0  ;;  %p1168_p12 = por %p186_p8, %p46_p3 }
  0x19   : > { %p1172_p13 = pnand %p722_p9, %p193_p10  ;;  %s1066_s12 = smov [#allocation8]  }
  0x1a   : > { %s1442_s9 = scalar_select %p1164_p11, 1, 0 }
  0x1b   : > { %s1443_s10 = scalar_select %p1168_p12, 1, 0 }
  0x1c   : > { %s1444_s11 = scalar_select %p1172_p13, 1, 0 }
  0x1d   : > { %p796_p1 = pneg %p1172_p13  ;;  %s205_s13 = sshll.u32 %s1066_s12, 4  ;;  %s206_s13 = int_to_ptr.vmem [resolvable:$true] %s205_s13 }
  0x1e   : > { %s1067_s15 = smov [#allocation9]   ;;  %s1446_s2 = sld [smem:[#allocation20_spill]] }
  0x1f   : > { %p1180_p2 = pnand %p796_p1, %p1426_p4  ;;  %s218_s16 = sshll.u32 %s1067_s15, 4  ;;  %s219_s16 = int_to_ptr.vmem [resolvable:$true] %s218_s16 }
  0x21   : > { %p871_p8 = pneg %p1180_p2 }
  0x24   : > { %s869_s19 = scalar_lea.hbm %s1446_s2, 512 }
  0x25   : > { %p870_p7 = scmp.ne.s32.totalorder %s1446_s2, %s869_s19  ;;  %p876_p1 = scmp.lt.u32.totalorder %s869_s19, %s1446_s2 }
  0x27   : > { %p872_p9 = pnand %p871_p8, %p870_p7 }
  0x29   : > { %p873_p10 = pneg %p872_p9 }
  0x2b   : > { %p878_p0 = pnand %p876_p1, %p873_p10 }
  0x2d   : > { %881 = shalt.err (!%p878_p0)
}
  0x2e   : > { %s882_s12 = scalar_lea.vmem %s206_s13, 512  ;;  %p890_p11 = scmp.lt.s32.totalorder %s206_s13, %s206_s13 }
  0x2f   : > { %p883_p4 = scmp.ne.s32.totalorder %s206_s13, %s882_s12  ;;  %p891_p6 = scmp.lt.s32.totalorder %s882_s12, %s882_s12 }
  0x31   : > { %p885_p3 = pnand %p883_p4, %p871_p8  ;;  %p892_p13 = por %p891_p6, %p890_p11 }
  0x33   : > { %p886_p12 = pneg %p885_p3 }
  0x35   : > { %p893_p5 = pnand %p892_p13, %p886_p12 }
  0x37   : > { %896 = shalt.err (!%p893_p5)
}
  0x38   : > { %s1432_s15 = smov 128   ;;  %s1069_s17 = smov 8  }
  0x39   : > { %799 = dma.hbm_to_vmem [thread:$0]  (!%p1180_p2), %s1446_s2, 512, %s206_s13, [#allocation7], %s1432_s15, %s1432_s15, %s1069_s17  }
  0x3a   : > { %p1447_p4 = scmp.ne.s32.totalorder %s1440_s7, 0  ;;  %p1448_p0 = scmp.lt.s32.totalorder %s1064_s24, 2 }
  0x3b   : > { %s1450_s3 = sld [smem:[#allocation21_spill]] }
  0x3c   : > { %p1215_p3 = pnand %p1448_p0, %p1447_p4 }
  0x3e   : > { %s1449_s20 = scalar_select %p1215_p3, 1, 0 }
  0x41   : > { %s897_s29 = scalar_lea.hbm %s1450_s3, 256 }
  0x42   : > { %p898_p5 = scmp.ne.s32.totalorder %s1450_s3, %s897_s29  ;;  %p904_p12 = scmp.lt.u32.totalorder %s897_s29, %s1450_s3 }
  0x44   : > { %p900_p6 = pnand %p898_p5, %p871_p8 }
  0x46   : > { %p901_p11 = pneg %p900_p6 }
  0x48   : > { %p906_p13 = pnand %p904_p12, %p901_p11 }
  0x4a   : > { %909 = shalt.err (!%p906_p13)
}
  0x4b   : > { %s910_s18 = scalar_lea.vmem %s219_s16, 256  ;;  %p918_p1 = scmp.lt.s32.totalorder %s219_s16, %s219_s16 }
  0x4c   : > { %p911_p7 = scmp.ne.s32.totalorder %s219_s16, %s910_s18  ;;  %p919_p4 = scmp.lt.s32.totalorder %s910_s18, %s910_s18 }
  0x4e   : > { %p913_p9 = pnand %p911_p7, %p871_p8  ;;  %p920_p0 = por %p919_p4, %p918_p1 }
  0x50   : > { %p914_p10 = pneg %p913_p9 }
  0x52   : > { %p921_p3 = pnand %p920_p0, %p914_p10 }
  0x54   : > { %924 = shalt.err (!%p921_p3)
}
  0x55   : > { %802 = dma.hbm_to_vmem [thread:$0]  (!%p1180_p2), %s1450_s3, 256, %s219_s16, [#allocation10], %s1432_s15, %s1432_s15, %s1069_s17  }
  0x56   : > { %s238_s26 = sand.u32 1, %s1060_s23   ;;  %s1431_s29 = sshll.u32 %s1064_s24, 9 }
  0x57   : > { %s1243_s28 = sshll.u32 %s238_s26, 4  ;;  %s1451_s0 = sld [smem:[#allocation19_spill]] }
  0x58   : > { %s242_s7 = scalar_lea.vmem [#allocation3], %s1243_s28  ;;  %s1256_s16 = scalar_lea.sflag [#allocation4], %s238_s26 }
  0x59   : > { %s249_s18 = sshll.u32 %s242_s7, 4  ;;  %p1452_p8 = scmp.ne.s32.totalorder %s1449_s20, 0  ;;  %s1254_s18 = int_to_ptr.vmem [resolvable:$true] %s249_s18 }
  0x5b   : > { %p927_p3 = pneg %p1452_p8 }
  0x5d   : > { %s1251_s13 = scalar_lea.hbm %s1451_s0, %s1431_s29  ;;  %s930_s14 = scalar_lea.hbm %s1451_s0, 1024 }
  0x5e   : > { %s925_s30 = scalar_lea.hbm %s1251_s13, 256  ;;  %p931_p11 = scmp.lt.u32.totalorder %s1251_s13, %s1451_s0 }
  0x5f   : > { %p926_p2 = scmp.ne.s32.totalorder %s1251_s13, %s925_s30  ;;  %p932_p12 = scmp.lt.u32.totalorder %s930_s14, %s925_s30 }
  0x60   : > { %p934_p7 = scmp.lt.u32.totalorder %s925_s30, %s1251_s13 }
  0x61   : > { %p928_p5 = pnand %p927_p3, %p926_p2  ;;  %p933_p13 = por %p932_p12, %p931_p11 }
  0x63   : > { %p929_p6 = pneg %p928_p5  ;;  %p935_p9 = por %p934_p7, %p933_p13 }
  0x65   : > { %p936_p10 = pnand %p935_p9, %p929_p6 }
  0x67   : > { %939 = shalt.err (!%p936_p10)
}
  0x68   : > { %s940_s26 = scalar_lea.vmem %s1254_s18, 256  ;;  %s1070_s7 = smov [#allocation3]  }
  0x69   : > { %p941_p1 = scmp.ne.s32.totalorder %s1254_s18, %s940_s26  ;;  %s945_s19 = sshll.u32 %s1070_s7, 4  ;;  %s946_s19 = int_to_ptr.vmem [resolvable:$false] %s945_s19 }
  0x6a   : > { %s947_s15 = scalar_lea.vmem %s946_s19, 512  ;;  %p948_p2 = scmp.lt.s32.totalorder %s1254_s18, %s946_s19 }
  0x6b   : > { %p943_p4 = pnand %p941_p1, %p927_p3  ;;  %p949_p5 = scmp.lt.s32.totalorder %s947_s15, %s940_s26 }
  0x6d   : > { %p944_p0 = pneg %p943_p4  ;;  %p950_p11 = por %p949_p5, %p948_p2 }
  0x6f   : > { %p951_p12 = pnand %p950_p11, %p944_p0 }
  0x71   : > { %954 = shalt.err (!%p951_p12)
}
  0x72   : > { %s1071_s29 = smov 256   ;;  %s1453_s30 = smov 128  }
  0x73   : > { %806 = dma.hbm_to_vmem [thread:$0]  (!%p1452_p8), %s1251_s13, 256, %s1254_s18, %s1256_s16, %s1071_s29, %s1453_s30, %s1069_s17  }
  0x74   : > { %s1454_s12 = sshll.u32 %s1064_s24, 9  ;;  %s263_s15 = scalar_lea.vmem [#allocation6], %s1243_s28 }
  0x75   : > { %s645_s7 = scalar_lea.hbm %s1420_s1, %s1454_s12  ;;  %s271_s0 = sshll.u32 %s263_s15, 4  ;;  %s1295_s0 = int_to_ptr.vmem [resolvable:$true] %s271_s0 }
  0x76   : > { %s1292_s19 = scalar_lea.hbm %s645_s7, 128  ;;  %s259_s2 = sand.u32 1, %s1064_s24  }
  0x77   : > { %s1298_s3 = scalar_lea.sflag [#allocation7], %s259_s2  ;;  %s985_s23 = scalar_lea.hbm %s645_s7, 384 }
  0x78   : > { %p956_p6 = scmp.ne.s32.totalorder %s1292_s19, %s985_s23  ;;  %s960_s16 = scalar_lea.hbm %s1420_s1, 1024 }
  0x79   : > { %p961_p9 = scmp.lt.u32.totalorder %s1292_s19, %s1420_s1  ;;  %p962_p10 = scmp.lt.u32.totalorder %s960_s16, %s985_s23 }
  0x7a   : > { %p958_p13 = pnand %p956_p6, %p927_p3  ;;  %p964_p4 = scmp.lt.u32.totalorder %s985_s23, %s1292_s19 }
  0x7b   : > { %p963_p1 = por %p962_p10, %p961_p9 }
  0x7c   : > { %p959_p7 = pneg %p958_p13 }
  0x7d   : > { %p965_p0 = por %p964_p4, %p963_p1 }
  0x7f   : > { %p966_p2 = pnand %p965_p0, %p959_p7 }
  0x81   : > { %969 = shalt.err (!%p966_p2)
}
  0x82   : > { %s970_s2 = scalar_lea.vmem %s1295_s0, 256  ;;  %s1072_s28 = smov [#allocation6]  }
  0x83   : > { %p971_p5 = scmp.ne.s32.totalorder %s1295_s0, %s970_s2  ;;  %s975_s26 = sshll.u32 %s1072_s28, 4  ;;  %s976_s26 = int_to_ptr.vmem [resolvable:$false] %s975_s26 }
  0x84   : > { %s977_s7 = scalar_lea.vmem %s976_s26, 512  ;;  %p978_p6 = scmp.lt.s32.totalorder %s1295_s0, %s976_s26 }
  0x85   : > { %p973_p11 = pnand %p971_p5, %p927_p3  ;;  %p979_p13 = scmp.lt.s32.totalorder %s977_s7, %s970_s2 }
  0x87   : > { %p974_p12 = pneg %p973_p11  ;;  %p980_p9 = por %p979_p13, %p978_p6 }
  0x89   : > { %p981_p10 = pnand %p980_p9, %p974_p12 }
  0x8b   : > { %984 = shalt.err (!%p981_p10)
}
  0x8c   : > { %809 = dma.hbm_to_vmem [thread:$0]  (!%p1452_p8), %s1292_s19, 256, %s1295_s0, %s1298_s3, %s1071_s29, %s1453_s30, %s1069_s17  }
  0x8d   : > { %p1455_p3 = scmp.ne.s32.totalorder %s1444_s11, 0 }
  0x8e   : > { %s1329_s23 = sand.u32 (!%p1455_p3), 1, %s1056_s22   ;;  %p1456_p7 = scmp.ne.s32.totalorder (!%p1455_p3), %s1441_s8, 0 }
  0x8f   : > { %283 = sbr.rel (%p1455_p3) target bundleno = 812 (0x32c), region = 44  ;;  %s1332_s15 = sshll.u32 (!%p1455_p3), %s1329_s23, 4 }
  0x90   : > { %s286_s20 = scalar_lea.sflag (!%p1455_p3), [#allocation4], %s1329_s23  ;;  %s289_s13 = scalar_lea.vmem (!%p1455_p3), [#allocation3], %s1332_s15 }
  0x96   : > { %1031 = dma.done.wait (%p1456_p7), %s286_s20, 256  }
  0x97   : > { %1033 = vsyncadd (%p1456_p7), %s286_s20, 4294967040  ;;  %s294_s0 = sand.u32 1, %s1133_s25   ;;  %s298_s11 = scalar_lea.vmem [#allocation6], %s1332_s15 }
  0x98   : > { %s295_s3 = scalar_lea.sflag [#allocation7], %s294_s0 }
  0x99   : > { %1035 = dma.done.wait (%p1456_p7), %s295_s3, 256  }
  0x9a   : > { %1037 = vsyncadd (%p1456_p7), %s295_s3, 4294967040  ;;  %p1457_p8 = scmp.eq.s32.totalorder %s1133_s25, 0 }
  0x9c   : > { %1039 = dma.done.wait (%p1457_p8), [#allocation7], 512   ;;  %p1458_p1 = pmov %p1457_p8 }
  0x9e   : > { %1041 = vsyncadd (%p1458_p1), [#allocation7], 4294966784  ;;  %p1459_p4 = pmov %p1458_p1 }
  0x9f   : > { %p1460_p0 = pmov %p1458_p1 }
  0xa0   : > { %1043 = dma.done.wait (%p1459_p4), [#allocation10], 256  }
  0xa1   : > { %1045 = vsyncadd (%p1460_p0), [#allocation10], 4294967040  ;;  %v342_v0 = vld [vmem:[%s298_s11] sm:$0xff]  ;;  %v343_v1 = vld [vmem:[%s298_s11 + $0x8] sm:$0xff]  ;;  %vm395_vm0 = vcmask 130048   ;;  %s1073_s19 = smov 64  }
  0xa2   : > { %344 = vadd.xlane.f32.xlu0 %v342_v0  ;;  %v351_v2 = vmul.f32 %v342_v0, %v342_v0  ;;  %v352_v3 = vmul.f32 %v343_v1, %v343_v1  ;;  %v738_v23 = vld [vmem:[%s1423_s4] ss:$0 sm:$0xff]  ;;  %v478_v28 = vld [vmem:[#allocation8 + $0x10] sm:$0xff]  ;;  %v394_v36 = vld [vmem:[#allocation8 + $0x8] sm:$0xff]  ;;  %vm577_vm1 = vcmask 523264   ;;  %s339_s18 = scalar_lea.vmem [#allocation11], %s1332_s15 }
  0xa3   : > { %v739_v29 = vld [vmem:[%s1424_s5] ss:$0 sm:$0xff]  ;;  %771 = vmatprep.mubr.msk.f32.mxu1 %vm395_vm0, %v478_v28  ;;  %v479_v41 = vld [vmem:[#allocation8 + $0x18] sm:$0xff]  ;;  %s604_s16 = sshll.u32 %s339_s18, 4  ;;  %v581_v51 = vld [vmem:[#allocation9 + $0x8] sm:$0xff]  ;;  %s751_s12 = sshll.u32 %s1133_s25, 8  ;;  %s1370_s16 = int_to_ptr.vmem [resolvable:$true] %s604_s16 }
  0xa4   : > { %353 = vadd.xlane.f32.xlu1 %v351_v2  ;;  %v393_v31 = vld [vmem:[#allocation8] sm:$0xff]  ;;  %v585_v54 = vld [vmem:[%s289_s13 + $0x8] sm:$0xff]  ;;  %s1375_s28 = scalar_lea.hbm %s1425_s6, %s751_s12  ;;  %s591_s26 = scalar_lea.sflag [#allocation5], %s1329_s23 }
  0xa5   : > { %764 = vmatprep.mubr.msk.f32.mxu0 %vm395_vm0, %v393_v31  ;;  %v580_v46 = vld [vmem:[#allocation9] sm:$0xff]  ;;  %s986_s7 = scalar_lea.vmem %s1370_s16, 256  ;;  %p1461_p5 = scmp.ne.s32.totalorder %s1442_s9, 0 }
  0xa6   : > { %346 = vadd.xlane.f32.xlu0 %v343_v1  ;;  %v584_v49 = vld [vmem:[%s289_s13] sm:$0xff]  ;;  %p987_p2 = scmp.ne.s32.totalorder %s1370_s16, %s986_s7  ;;  %s1074_s25 = smov [#allocation11]  }
  0xa7   : > { %s990_s15 = sshll.u32 %s1074_s25, 4  ;;  %s991_s15 = int_to_ptr.vmem [resolvable:$false] %s990_s15 }
  0xa8   : > { %355 = vadd.xlane.f32.xlu1 %v352_v3  ;;  %p988_p11 = pnand %p987_p2, %p1461_p5  ;;  %s992_s20 = scalar_lea.vmem %s991_s15, 512 }
  0xa9   : > { %p993_p6 = scmp.lt.s32.totalorder %s1370_s16, %s991_s15  ;;  %p994_p13 = scmp.lt.s32.totalorder %s992_s20, %s986_s7 }
  0xaa   : > { %p989_p12 = pneg %p988_p11 }
  0xab   : > { %p995_p9 = por %p994_p13, %p993_p6 }
  0xad   : > { %p996_p10 = pnand %p995_p9, %p989_p12 }
 0x12f   : > { %v345_v4 = vpop.xlane.xlu0 %344 }
 0x130   : > { %v349_v5 = vmul.f32 0.0078125, %v345_v4 }
 0x131   : > { %v354_v6 = vpop.xlane.xlu1 %353 }
 0x132   : > { %v359_v7 = vmul.f32 %v349_v5, %v349_v5  ;;  %v357_v8 = vmul.f32 0.0078125, %v354_v6  ;;  %v365_v20 = vsub.f32 %v342_v0, %v349_v5 }
 0x133   : > { %v347_v9 = vpop.xlane.xlu0 %346 }
 0x134   : > { %v361_v10 = vsub.f32 %v357_v8, %v359_v7  ;;  %v350_v11 = vmul.f32 0.0078125, %v347_v9 }
 0x135   : > { %v356_v12 = vpop.xlane.xlu1 %355 }
 0x136   : > { %v363_v13 = vmax.f32 %v361_v10, 0.0  ;;  %v360_v14 = vmul.f32 %v350_v11, %v350_v11  ;;  %v358_v15 = vmul.f32 0.0078125, %v356_v12  ;;  %v366_v24 = vsub.f32 %v343_v1, %v350_v11 }
 0x138   : > { %v367_v16 = vadd.f32 1e-05, %v363_v13  ;;  %v362_v17 = vsub.f32 %v358_v15, %v360_v14 }
 0x13a   : > { %865 = vrsqrt.f32 %v367_v16  ;;  %v364_v18 = vmax.f32 %v362_v17, 0.0 }
 0x13c   : > { %v368_v19 = vadd.f32 1e-05, %v364_v18 }
 0x13e   : > { %867 = vrsqrt.f32 %v368_v19 }
 0x144   : > { %v866_v21 = vpop.eup %865 }
 0x145   : > { %v371_v22 = vmul.f32 %v866_v21, %v365_v20 }
 0x147   : > { %v379_v27 = vmul.f32 %v738_v23, %v371_v22 }
 0x148   : > { %v868_v25 = vpop.eup %867 }
 0x149   : > { %v372_v26 = vmul.f32 %v868_v25, %v366_v24  ;;  %v387_v32 = vadd.f32 %v739_v29, %v379_v27 }
 0x14b   : > { %v380_v30 = vmul.f32 %v738_v23, %v372_v26 }
 0x14d   : > { %v388_v33 = vadd.f32 %v739_v29, %v380_v30 }
 0x14f   : > { %v860_v34 = vpack.i.bf16 %v388_v33, %v387_v32  ;;  %v774_v35 = vpack.c.bf16 %v388_v33, %v387_v32 }
 0x151   : > { %861 = vrot.lane.b32.xlu0 %v860_v34, %s1073_s19  ;;  %775 = vmatprep.subr.bf16.mxu0 %v774_v35 }
 0x152   : > { %777 = vmatpush3.bf16.msra.mxu0 %v774_v35 }
 0x155   : > { %765 = vmatmul.mubr.msk.f32.vlgmr.msra.gmra.mrb[0].mxu0 %vm395_vm0, %v394_v36 }
 0x1c3   : > { %v862_v37 = vpop.permute.xlu0 %861 }
 0x1c4   : > { %v864_v38 = vunpack.i.h.bf16 %v862_v37  ;;  %v863_v39 = vunpack.i.l.bf16 %v862_v37 }
 0x1c6   : > { %v778_v40 = vpack.c.bf16 %v864_v38, %v863_v39 }
 0x1c8   : > { %779 = vmatprep.subr.bf16.mxu1 %v778_v40 }
 0x1c9   : > { %781 = vmatpush3.bf16.msra.mxu1 %v778_v40 }
 0x1cc   : > { %772 = vmatmul.mubr.msk.f32.vlgmr.msra.gmra.mrb[0].mxu1 %vm395_vm0, %v479_v41 }
 0x228   : > { %v766_v42 = vpop.f32.mrb[0].mxu0 }
 0x229   : > { %v468_v43 = vpop.f32.mrb[1].mxu0 }
 0x29f   : > { %v773_v44 = vpop.f32.mrb[0].mxu1 }
 0x2a0   : > { %v560_v45 = vpop.f32.mrb[1].mxu1 }
 0x2a1   : > { %571 = vrot.lane.b32.xlu1 %v560_v45, %s1073_s19 }
 0x2a5   : > { %573 = vrot.lane.b32.xlu1 %v773_v44, %s1073_s19 }
 0x313   : > { %v572_v47 = vpop.permute.xlu1 %571 }
 0x314   : > { %v578_v48 = vsel %vm577_vm1, %v468_v43, %v572_v47 }
 0x315   : > { %v582_v50 = vadd.f32 %v580_v46, %v578_v48 }
 0x317   : > { %v586_v52 = vmul.f32 %v584_v49, %v582_v50  ;;  %v574_v53 = vpop.permute.xlu1 %573 }
 0x318   : > { %v579_v55 = vsel %vm577_vm1, %v766_v42, %v574_v53 }
 0x319   : > { %588 = vst [vmem:[%s339_s18] sm:$0xff] %v586_v52  ;;  %v583_v56 = vadd.f32 %v581_v51, %v579_v55 }
 0x31b   : > { %v587_v57 = vmul.f32 %v585_v54, %v583_v56 }
 0x31d   : > { %589 = vst [vmem:[%s339_s18 + $0x8] sm:$0xff] %v587_v57 }
 0x31e   : > { %999 = shalt.err (!%p996_p10)
}
 0x31f   : > { %s1000_s13 = scalar_lea.hbm %s1375_s28, 256  ;;  %s1004_s11 = scalar_lea.hbm %s1425_s6, 512 }
 0x320   : > { %p1001_p3 = scmp.ne.s32.totalorder %s1375_s28, %s1000_s13  ;;  %p1005_p1 = scmp.lt.u32.totalorder %s1375_s28, %s1425_s6 }
 0x321   : > { %p1006_p4 = scmp.lt.u32.totalorder %s1004_s11, %s1000_s13  ;;  %p1008_p2 = scmp.lt.u32.totalorder %s1000_s13, %s1375_s28 }
 0x322   : > { %p1002_p7 = pnand %p1001_p3, %p1461_p5 }
 0x323   : > { %p1007_p0 = por %p1006_p4, %p1005_p1 }
 0x324   : > { %p1003_p8 = pneg %p1002_p7 }
 0x325   : > { %p1009_p11 = por %p1008_p2, %p1007_p0 }
 0x327   : > { %p1010_p12 = pnand %p1009_p11, %p1003_p8 }
 0x329   : > { %1013 = shalt.err (!%p1010_p12)
}
 0x32a   : > { %s1075_s29 = smov 128   ;;  %s1076_s30 = smov 8  }
 0x32b   : > { %794 = dma.vmem_to_hbm [thread:$0]  (%p1461_p5), %s1370_s16, 256, %s1375_s28, %s591_s26, %s1075_s29, %s1075_s29, %s1076_s30  }
 0x32c PF: > { %s619_s19 = sand.u32 1, %s1052_s21   ;;  %p1462_p6 = scmp.ne.s32.totalorder %s1443_s10, 0 }
 0x32d   : > { %p1463_p13 = scmp.ge.s32.totalorder %s1064_s24, 2  ;;  %s620_s18 = scalar_lea.sflag [#allocation5], %s619_s19 }
 0x32f   : > { %p811_p9 = pnand %p1463_p13, %p1462_p6 }
 0x331   : > { %1047 = dma.done.wait (!%p811_p9), %s620_s18, 256  }
 0x332   : > { %1049 = vsyncadd (!%p811_p9), %s620_s18, 4294967040  ;;  %s1464_s12 = sld [smem:[#allocation17_spill]]  ;;  %s1465_s23 = sld [smem:[#allocation18_spill]] }
 0x333   : > { %p23_p10 = scmp.ge.s32.totalorder %s1137_s27, 4   ;;  %s1466_s21 = smov %s1056_s22 }
 0x334   : > { %s1468_s24 = smov %s1137_s27 }
 0x335   :  { %25 = sbr.rel (!%p23_p10) target bundleno = 12 (0xc), region = 111 }
 0x338   : > { %s1467_s22 = smov %s1464_s12 }
 0x33c   :  { %625 = vsyncpa [#allocation4], 1 }
 0x33d   :  { %627 = vsyncpa [#allocation4 + $0x1], 1 }
 0x33e   :  { %628 = vsyncpa [#allocation7], 1 }
 0x33f   :  { %630 = vsyncpa [#allocation7 + $0x1], 1 }
 0x340   :  { %631 = vsyncpa [#allocation10], 1 }
 0x341   :  { %632 = vsyncpa [#allocation5], 1 }
 0x342   :  { %634 = vsyncpa [#allocation5 + $0x1], 1 }

</bundles_post_ra>
